<compile_context>
chip_gen: v7x
topology: tpu7x:2x2x1
jax: 0.10.0
libtpu: 0.0.40
codegen_flags: <defaults>
</compile_context>

<pallas_src>
import functools

import jax
import jax.numpy as jnp
from jax import lax
from jax.experimental import pallas as pl
from jax.experimental.pallas import tpu as pltpu

NOISE_STD = 0.1
LANES = 128
TILE_ROWS = 4096  # (4096, 128) f32 block = 2 MiB / buffer -> ~8 MiB double-buffered


def _srl(v, k):
    # Logical right shift with an explicit int32 shift amount (lax wants
    # matching dtypes).
    return lax.shift_right_logical(v, jnp.int32(k))


def _hash_counter(idx, seed):
    """Murmur3-style avalanche of (global element index, seed); int32 wraparound."""
    h = idx * jnp.int32(-1640531527) + seed * jnp.int32(668265263)
    h = h ^ _srl(h, 16)
    h = h * jnp.int32(-2048144789)   # 0x85EBCA6B
    h = h ^ _srl(h, 13)
    h = h * jnp.int32(-1028477379)   # 0xC2B2AE35
    h = h ^ _srl(h, 16)
    return h


def _erfinv_f32(t):
    """Single-precision erfinv (Giles 2012): only mul/add/log/sqrt/where."""
    w = -jnp.log((1.0 - t) * (1.0 + t))
    ws = w - 2.5
    wb = jnp.sqrt(w) - 3.0
    p_s = jnp.float32(2.81022636e-08)
    for c in (3.43273939e-07, -3.5233877e-06, -4.39150654e-06, 2.1858087e-04,
              -1.25372503e-03, -4.17768164e-03, 2.46640727e-01, 1.50140941):
        p_s = p_s * ws + jnp.float32(c)
    p_b = jnp.float32(-2.00214257e-04)
    for c in (1.00950558e-04, 1.34934322e-03, -3.67342844e-03, 5.73950773e-03,
              -7.6224613e-03, 9.43887047e-03, 1.00167406, 2.83297682):
        p_b = p_b * wb + jnp.float32(c)
    return jnp.where(w < 5.0, p_s, p_b) * t


def _channel_kernel(seed_ref, x_ref, o_ref, *, noise_std, tile_rows):
    seed = seed_ref[0]
    block = pl.program_id(0)
    rows, lanes = x_ref.shape

    # Global element index of every lane in this block (unique across the grid,
    # independent of the tiling choice).
    r = lax.broadcasted_iota(jnp.int32, (rows, lanes), 0)
    c = lax.broadcasted_iota(jnp.int32, (rows, lanes), 1)
    gidx = (block * tile_rows + r) * lanes + c

    # counter hash -> uniform(0,1) -> standard normal via inverse CDF.
    h = _hash_counter(gidx, seed)
    bits = _srl(h, 9)  # 23 well-mixed bits in [0, 2^23)
    u = bits.astype(jnp.float32) * jnp.float32(2.0 ** -23) + jnp.float32(2.0 ** -24)
    z = jnp.float32(1.4142135623730951) * _erfinv_f32(2.0 * u - 1.0)

    noise = (z * jnp.float32(noise_std)).astype(x_ref.dtype)
    o_ref[...] = x_ref[...] + noise


def channel_forward(x, seed, noise_std=NOISE_STD):
    """Equivalent of Channel.forward: x + randn_like(x) * noise_std."""
    orig_shape = x.shape
    n = x.size
    if n == 0:
        return x

    rows = -(-n // LANES)            # ceil-div into 128-wide lanes
    rows = ((rows + 7) // 8) * 8     # sublane-align (f32 min tile is (8, 128))
    tile_rows = min(TILE_ROWS, rows)  # rows is a multiple of 8, so tile is too
    num_blocks = -(-rows // tile_rows)
    rows_padded = num_blocks * tile_rows
    padded = rows_padded * LANES

    x_flat = x.reshape(-1)
    if padded != n:
        x_flat = jnp.pad(x_flat, (0, padded - n))
    x2d = x_flat.reshape(rows_padded, LANES)

    seed_arr = jnp.asarray([seed], dtype=jnp.int32)
    kernel = functools.partial(_channel_kernel, noise_std=noise_std,
                               tile_rows=tile_rows)

    out2d = pl.pallas_call(
        kernel,
        out_shape=jax.ShapeDtypeStruct((rows_padded, LANES), x.dtype),
        grid_spec=pltpu.PrefetchScalarGridSpec(
            num_scalar_prefetch=1,  # seed lands in SMEM
            grid=(num_blocks,),
            in_specs=[pl.BlockSpec((tile_rows, LANES), lambda i, seed_ref: (i, 0))],
            out_specs=pl.BlockSpec((tile_rows, LANES), lambda i, seed_ref: (i, 0)),
        ),
        compiler_params=pltpu.CompilerParams(
            # Blocks are fully independent (counter-keyed noise), so the row
            # axis can be sharded across v7x's two TensorCores.
            dimension_semantics=("parallel",),
        ),
    )(seed_arr, x2d)

    out_flat = out2d.reshape(-1)
    if padded != n:
        out_flat = out_flat[:n]
    return out_flat.reshape(orig_shape)


if __name__ == "__main__":
    key = jax.random.PRNGKey(0)
    # Small NCHW input, consistent with a conv-style pipeline.
    x = jax.random.normal(key, (2, 4, 16, 16), dtype=jnp.float32)

    y = channel_forward(x, seed=1234, noise_std=NOISE_STD)
    y = jax.block_until_ready(y)

    # Shape/dtype preserved; noise has ~zero mean and std ~= noise_std.
    assert y.shape == x.shape and y.dtype == x.dtype
    resid = y - x
    resid_std = float(jnp.std(resid))
    resid_mean = float(jnp.mean(resid))
    assert 0.06 < resid_std < 0.15, f"unexpected noise std {resid_std}"
    assert abs(resid_mean) < 0.03, f"unexpected noise mean {resid_mean}"

    # Deterministic per seed; different seeds give different noise.
    y2 = jax.block_until_ready(channel_forward(x, seed=1234, noise_std=NOISE_STD))
    y3 = jax.block_until_ready(channel_forward(x, seed=4321, noise_std=NOISE_STD))
    assert bool(jnp.all(y == y2))
    assert not bool(jnp.all(y == y3))

    # Shapes that are not multiples of (8, 128) are handled via padding.
    x_odd = jax.random.normal(jax.random.PRNGKey(1), (2, 3, 7, 5), dtype=jnp.float32)
    y_odd = jax.block_until_ready(channel_forward(x_odd, seed=7, noise_std=NOISE_STD))
    assert y_odd.shape == x_odd.shape and y_odd.dtype == x_odd.dtype
    odd_std = float(jnp.std(y_odd - x_odd))
    assert 0.05 < odd_std < 0.2, f"unexpected noise std {odd_std}"

    print("KERNEL_OK")
</pallas_src>

<mosaic_0001>
module attributes {stable_mosaic.version = 11 : i64} {
  func.func @_channel_kernel(%arg0: i32, %arg1: memref<1xi32, #tpu.memory_space<smem>>, %arg2: memref<16x128xf32, #tpu.memory_space<vmem>>, %arg3: memref<16x128xf32, #tpu.memory_space<vmem>>) attributes {dimension_semantics = [#tpu.dimension_semantics<parallel>], iteration_bounds = array<i64: 1>, scalar_prefetch = 1 : i64, scratch_operands = 0 : i64, tpu.core_type = #tpu.core_type<tc>, window_params = [{transform_indices = @transform_0, window_bounds = array<i64: 16, 128>}, {transform_indices = @transform_1, window_bounds = array<i64: 16, 128>}]} {
    %c0 = arith.constant 0 : index
    %0 = memref.load %arg1[%c0] : memref<1xi32, #tpu.memory_space<smem>>
    %1 = tpu.iota {dimensions = array<i32: 0>} : vector<16x128xi32>
    %2 = tpu.iota {dimensions = array<i32: 1>} : vector<16x128xi32>
    %c16_i32 = arith.constant 16 : i32
    %3 = arith.muli %arg0, %c16_i32 : i32
    %4 = vector.broadcast %3 : i32 to vector<16x128xi32>
    %5 = arith.addi %4, %1 : vector<16x128xi32>
    %c128_i32 = arith.constant 128 : i32
    %6 = vector.broadcast %c128_i32 : i32 to vector<16x128xi32>
    %7 = arith.muli %5, %6 : vector<16x128xi32>
    %8 = arith.addi %7, %2 : vector<16x128xi32>
    %c-1640531527_i32 = arith.constant -1640531527 : i32
    %9 = vector.broadcast %c-1640531527_i32 : i32 to vector<16x128xi32>
    %10 = arith.muli %8, %9 : vector<16x128xi32>
    %c668265263_i32 = arith.constant 668265263 : i32
    %11 = arith.muli %0, %c668265263_i32 : i32
    %12 = vector.broadcast %11 : i32 to vector<16x128xi32>
    %13 = arith.addi %10, %12 : vector<16x128xi32>
    %c16_i32_0 = arith.constant 16 : i32
    %14 = vector.broadcast %c16_i32_0 : i32 to vector<16x128xi32>
    %15 = arith.shrui %13, %14 : vector<16x128xi32>
    %16 = arith.xori %13, %15 : vector<16x128xi32>
    %c-2048144789_i32 = arith.constant -2048144789 : i32
    %17 = vector.broadcast %c-2048144789_i32 : i32 to vector<16x128xi32>
    %18 = arith.muli %16, %17 : vector<16x128xi32>
    %c13_i32 = arith.constant 13 : i32
    %19 = vector.broadcast %c13_i32 : i32 to vector<16x128xi32>
    %20 = arith.shrui %18, %19 : vector<16x128xi32>
    %21 = arith.xori %18, %20 : vector<16x128xi32>
    %c-1028477379_i32 = arith.constant -1028477379 : i32
    %22 = vector.broadcast %c-1028477379_i32 : i32 to vector<16x128xi32>
    %23 = arith.muli %21, %22 : vector<16x128xi32>
    %c16_i32_1 = arith.constant 16 : i32
    %24 = vector.broadcast %c16_i32_1 : i32 to vector<16x128xi32>
    %25 = arith.shrui %23, %24 : vector<16x128xi32>
    %26 = arith.xori %23, %25 : vector<16x128xi32>
    %c9_i32 = arith.constant 9 : i32
    %27 = vector.broadcast %c9_i32 : i32 to vector<16x128xi32>
    %28 = arith.shrui %26, %27 : vector<16x128xi32>
    %29 = arith.sitofp %28 : vector<16x128xi32> to vector<16x128xf32>
    %cst = arith.constant 1.1920929E-7 : f32
    %30 = vector.broadcast %cst : f32 to vector<16x128xf32>
    %31 = arith.mulf %29, %30 : vector<16x128xf32>
    %cst_2 = arith.constant 5.96046448E-8 : f32
    %32 = vector.broadcast %cst_2 : f32 to vector<16x128xf32>
    %33 = arith.addf %31, %32 : vector<16x128xf32>
    %cst_3 = arith.constant 2.000000e+00 : f32
    %34 = vector.broadcast %cst_3 : f32 to vector<16x128xf32>
    %35 = arith.mulf %34, %33 : vector<16x128xf32>
    %cst_4 = arith.constant 1.000000e+00 : f32
    %36 = vector.broadcast %cst_4 : f32 to vector<16x128xf32>
    %37 = arith.subf %35, %36 : vector<16x128xf32>
    %cst_5 = arith.constant 1.000000e+00 : f32
    %38 = vector.broadcast %cst_5 : f32 to vector<16x128xf32>
    %39 = arith.subf %38, %37 : vector<16x128xf32>
    %cst_6 = arith.constant 1.000000e+00 : f32
    %40 = vector.broadcast %cst_6 : f32 to vector<16x128xf32>
    %41 = arith.addf %40, %37 : vector<16x128xf32>
    %42 = arith.mulf %39, %41 : vector<16x128xf32>
    %43 = math.log %42 : vector<16x128xf32>
    %cst_7 = arith.constant 0.000000e+00 : f32
    %44 = vector.broadcast %cst_7 : f32 to vector<16x128xf32>
    %45 = arith.subf %44, %43 : vector<16x128xf32>
    %cst_8 = arith.constant 2.500000e+00 : f32
    %46 = vector.broadcast %cst_8 : f32 to vector<16x128xf32>
    %47 = arith.subf %45, %46 : vector<16x128xf32>
    %48 = math.sqrt %45 : vector<16x128xf32>
    %cst_9 = arith.constant 3.000000e+00 : f32
    %49 = vector.broadcast %cst_9 : f32 to vector<16x128xf32>
    %50 = arith.subf %48, %49 : vector<16x128xf32>
    %cst_10 = arith.constant 2.81022636E-8 : f32
    %51 = vector.broadcast %cst_10 : f32 to vector<16x128xf32>
    %52 = arith.mulf %51, %47 : vector<16x128xf32>
    %cst_11 = arith.constant 3.43273939E-7 : f32
    %53 = vector.broadcast %cst_11 : f32 to vector<16x128xf32>
    %54 = arith.addf %52, %53 : vector<16x128xf32>
    %55 = arith.mulf %54, %47 : vector<16x128xf32>
    %cst_12 = arith.constant -3.5233877E-6 : f32
    %56 = vector.broadcast %cst_12 : f32 to vector<16x128xf32>
    %57 = arith.addf %55, %56 : vector<16x128xf32>
    %58 = arith.mulf %57, %47 : vector<16x128xf32>
    %cst_13 = arith.constant -4.39150654E-6 : f32
    %59 = vector.broadcast %cst_13 : f32 to vector<16x128xf32>
    %60 = arith.addf %58, %59 : vector<16x128xf32>
    %61 = arith.mulf %60, %47 : vector<16x128xf32>
    %cst_14 = arith.constant 2.1858087E-4 : f32
    %62 = vector.broadcast %cst_14 : f32 to vector<16x128xf32>
    %63 = arith.addf %61, %62 : vector<16x128xf32>
    %64 = arith.mulf %63, %47 : vector<16x128xf32>
    %cst_15 = arith.constant -0.00125372503 : f32
    %65 = vector.broadcast %cst_15 : f32 to vector<16x128xf32>
    %66 = arith.addf %64, %65 : vector<16x128xf32>
    %67 = arith.mulf %66, %47 : vector<16x128xf32>
    %cst_16 = arith.constant -0.00417768164 : f32
    %68 = vector.broadcast %cst_16 : f32 to vector<16x128xf32>
    %69 = arith.addf %67, %68 : vector<16x128xf32>
    %70 = arith.mulf %69, %47 : vector<16x128xf32>
    %cst_17 = arith.constant 0.246640727 : f32
    %71 = vector.broadcast %cst_17 : f32 to vector<16x128xf32>
    %72 = arith.addf %70, %71 : vector<16x128xf32>
    %73 = arith.mulf %72, %47 : vector<16x128xf32>
    %cst_18 = arith.constant 1.50140941 : f32
    %74 = vector.broadcast %cst_18 : f32 to vector<16x128xf32>
    %75 = arith.addf %73, %74 : vector<16x128xf32>
    %cst_19 = arith.constant -2.00214257E-4 : f32
    %76 = vector.broadcast %cst_19 : f32 to vector<16x128xf32>
    %77 = arith.mulf %76, %50 : vector<16x128xf32>
    %cst_20 = arith.constant 1.00950558E-4 : f32
    %78 = vector.broadcast %cst_20 : f32 to vector<16x128xf32>
    %79 = arith.addf %77, %78 : vector<16x128xf32>
    %80 = arith.mulf %79, %50 : vector<16x128xf32>
    %cst_21 = arith.constant 0.00134934322 : f32
    %81 = vector.broadcast %cst_21 : f32 to vector<16x128xf32>
    %82 = arith.addf %80, %81 : vector<16x128xf32>
    %83 = arith.mulf %82, %50 : vector<16x128xf32>
    %cst_22 = arith.constant -0.00367342844 : f32
    %84 = vector.broadcast %cst_22 : f32 to vector<16x128xf32>
    %85 = arith.addf %83, %84 : vector<16x128xf32>
    %86 = arith.mulf %85, %50 : vector<16x128xf32>
    %cst_23 = arith.constant 0.00573950773 : f32
    %87 = vector.broadcast %cst_23 : f32 to vector<16x128xf32>
    %88 = arith.addf %86, %87 : vector<16x128xf32>
    %89 = arith.mulf %88, %50 : vector<16x128xf32>
    %cst_24 = arith.constant -0.0076224613 : f32
    %90 = vector.broadcast %cst_24 : f32 to vector<16x128xf32>
    %91 = arith.addf %89, %90 : vector<16x128xf32>
    %92 = arith.mulf %91, %50 : vector<16x128xf32>
    %cst_25 = arith.constant 0.00943887047 : f32
    %93 = vector.broadcast %cst_25 : f32 to vector<16x128xf32>
    %94 = arith.addf %92, %93 : vector<16x128xf32>
    %95 = arith.mulf %94, %50 : vector<16x128xf32>
    %cst_26 = arith.constant 1.00167406 : f32
    %96 = vector.broadcast %cst_26 : f32 to vector<16x128xf32>
    %97 = arith.addf %95, %96 : vector<16x128xf32>
    %98 = arith.mulf %97, %50 : vector<16x128xf32>
    %cst_27 = arith.constant 2.83297682 : f32
    %99 = vector.broadcast %cst_27 : f32 to vector<16x128xf32>
    %100 = arith.addf %98, %99 : vector<16x128xf32>
    %cst_28 = arith.constant 5.000000e+00 : f32
    %101 = vector.broadcast %cst_28 : f32 to vector<16x128xf32>
    %102 = arith.cmpf olt, %45, %101 : vector<16x128xf32>
    %103 = arith.select %102, %75, %100 : vector<16x128xi1>, vector<16x128xf32>
    %104 = arith.mulf %103, %37 : vector<16x128xf32>
    %cst_29 = arith.constant 1.41421354 : f32
    %105 = vector.broadcast %cst_29 : f32 to vector<16x128xf32>
    %106 = arith.mulf %105, %104 : vector<16x128xf32>
    %cst_30 = arith.constant 1.000000e-01 : f32
    %107 = vector.broadcast %cst_30 : f32 to vector<16x128xf32>
    %108 = arith.mulf %106, %107 : vector<16x128xf32>
    %c0_31 = arith.constant 0 : index
    %c0_32 = arith.constant 0 : index
    %109 = vector.load %arg2[%c0_31, %c0_32] : memref<16x128xf32, #tpu.memory_space<vmem>>, vector<16x128xf32>
    %110 = arith.addf %109, %108 : vector<16x128xf32>
    %c0_33 = arith.constant 0 : index
    %c0_34 = arith.constant 0 : index
    %111 = vector.load %arg3[%c0_33, %c0_34] : memref<16x128xf32, #tpu.memory_space<vmem>>, vector<16x128xf32>
    tpu.vector_store %arg3[%c0_33, %c0_34], %110 {strides = array<i32>} : memref<16x128xf32, #tpu.memory_space<vmem>>, vector<16x128xf32>,
    return
  }
  func.func @transform_0(%arg0: i32, %arg1: memref<1xi32, #tpu.memory_space<smem>>) -> (i32, i32) {
    %c0_i32 = arith.constant 0 : i32
    %c0_i32_0 = arith.constant 0 : i32
    return %arg0, %c0_i32 : i32, i32
  }
  func.func @transform_1(%arg0: i32, %arg1: memref<1xi32, #tpu.memory_space<smem>>) -> (i32, i32) {
    %c0_i32 = arith.constant 0 : i32
    %c0_i32_0 = arith.constant 0 : i32
    return %arg0, %c0_i32 : i32, i32
  }
}

</mosaic_0001>

<bundles_post_ra>
// kernel: tpu_custom_call.1
= control target key start
LH: loop header
LB: loop body
LE: loop exit
PB: predicated region body
PF: predicated region fallthrough
CT: control target
= control target key end

     0   :  { %8 = vsyncpa [#allocation5], 0  ;;  %s368_s0 = inlined_call_operand.<no memory space> [shape: s32[1], index: 0, kind: input, shape index: {}]   ;;  %s369_s1 = inlined_call_operand.hbm [shape: f32[16,128], index: 1, kind: input, shape index: {}]   ;;  %s370_s2 = inlined_call_operand.hbm [shape: f32[16,128], index: 2, kind: output, shape index: {}]  }
   0x1   :  { %9 = vsyncpa [#allocation6], 0  ;;  %s266_s9 = smov [#allocation4]   ;;  %s218_s13 = scalar_lea.hbm %s369_s1, 256 }
   0x2   :  { %s15_s10 = sshll.u32 %s266_s9, 4  ;;  %p219_p0 = scmp.ne.s32.totalorder %s369_s1, %s218_s13  ;;  %s16_s10 = int_to_ptr.vmem [resolvable:$true] %s15_s10 }
   0x3   :  { %p222_p1 = scmp.lt.u32.totalorder %s218_s13, %s369_s1 }
   0x5   :  { %p224_p2 = pnand %p222_p1, %p219_p0 }
   0x7   :  { %227 = shalt.err (!%p224_p2)
}
   0x8   :  { %s228_s18 = scalar_lea.vmem %s16_s10, 256  ;;  %p233_p4 = scmp.lt.s32.totalorder %s16_s10, %s16_s10 }
   0x9   :  { %p229_p3 = scmp.ne.s32.totalorder %s16_s10, %s228_s18  ;;  %p234_p5 = scmp.lt.s32.totalorder %s228_s18, %s228_s18 }
   0xb   :  { %p235_p6 = por %p234_p5, %p233_p4 }
   0xd   :  { %p236_p7 = pnand %p235_p6, %p229_p3 }
   0xf   :  { %239 = shalt.err (!%p236_p7)
}
  0x10   :  { %s267_s19 = smov 128   ;;  %s268_s20 = smov 8  }
  0x11   :  { %21 = dma.hbm_to_vmem [thread:$0]  %s369_s1, 256, %s16_s10, [#allocation5], %s267_s19, %s267_s19, %s268_s20  }
  0x12   :  { %262 = dma.done.wait [#allocation5], 256  }
  0x13   :  { %263 = vsyncadd [#allocation5], 4294967040  ;;  %v26_v0 = vlaneseq  ;;  %s41_s25 = smul.u32 668265263, %s368_s0  ;;  %s269_s0 = smov [#allocation7]  }
  0x14   :  { %s188_s1 = sshll.u32 %s269_s0, 4  ;;  %s189_s1 = int_to_ptr.vmem [resolvable:$true] %s188_s1 }
  0x15   :  { %v27_v1 = vshrl.u32 %v26_v0, 7  ;;  %v30_v2 = vand.u32 127, %v26_v0  ;;  %v42_v7 = vstv %s41_s25  ;;  %s240_s26 = scalar_lea.vmem %s189_s1, 256  ;;  %p245_p9 = scmp.lt.s32.totalorder %s189_s1, %s189_s1 }
  0x16   :  { %p241_p8 = scmp.ne.s32.totalorder %s189_s1, %s240_s26  ;;  %p246_p10 = scmp.lt.s32.totalorder %s240_s26, %s240_s26 }
  0x17   :  { %v35_v3 = vmul.u32 128, %v27_v1  ;;  %v28_v4 = vadd.s32 8, %v27_v1 }
  0x18   :  { %p247_p11 = por %p246_p10, %p245_p9 }
  0x19   :  { %v37_v5 = vadd.s32 %v35_v3, %v30_v2  ;;  %v36_v6 = vmul.u32 128, %v28_v4 }
  0x1a   :  { %p248_p12 = pnand %p247_p11, %p241_p8 }
  0x1b   :  { %v39_v8 = vmul.u32 2654435769, %v37_v5  ;;  %v38_v9 = vadd.s32 %v36_v6, %v30_v2 }
  0x1d   :  { %v43_v10 = vadd.s32 %v42_v7, %v39_v8  ;;  %v40_v11 = vmul.u32 2654435769, %v38_v9 }
  0x1f   :  { %v45_v12 = vshrl.u32 %v43_v10, 16  ;;  %v44_v13 = vadd.s32 %v42_v7, %v40_v11 }
  0x21   :  { %v47_v14 = vxor.u32 %v45_v12, %v43_v10  ;;  %v46_v15 = vshrl.u32 %v44_v13, 16 }
  0x23   :  { %v49_v16 = vmul.u32 2246822507, %v47_v14  ;;  %v48_v17 = vxor.u32 %v46_v15, %v44_v13 }
  0x25   :  { %v51_v18 = vshrl.u32 %v49_v16, 13  ;;  %v50_v19 = vmul.u32 2246822507, %v48_v17 }
  0x27   :  { %v53_v20 = vxor.u32 %v51_v18, %v49_v16  ;;  %v52_v21 = vshrl.u32 %v50_v19, 13 }
  0x29   :  { %v55_v22 = vmul.u32 3266489917, %v53_v20  ;;  %v54_v23 = vxor.u32 %v52_v21, %v50_v19 }
  0x2b   :  { %v57_v24 = vshrl.u32 %v55_v22, 16  ;;  %v56_v25 = vmul.u32 3266489917, %v54_v23 }
  0x2d   :  { %v59_v26 = vxor.u32 %v57_v24, %v55_v22  ;;  %v58_v27 = vshrl.u32 %v56_v25, 16 }
  0x2f   :  { %v61_v28 = vshrl.u32 %v59_v26, 9  ;;  %v60_v29 = vxor.u32 %v58_v27, %v56_v25 }
  0x31   :  { %v63_v30 = vcvt.s32.f32 %v61_v28  ;;  %v62_v31 = vshrl.u32 %v60_v29, 9 }
  0x33   :  { %v65_v32 = vmul.f32 1.1920929e-07, %v63_v30  ;;  %v64_v33 = vcvt.s32.f32 %v62_v31 }
  0x35   :  { %v67_v34 = vadd.f32 5.9604645e-08, %v65_v32  ;;  %v66_v35 = vmul.f32 1.1920929e-07, %v64_v33 }
  0x37   :  { %v69_v36 = vmul.f32 2.0, %v67_v34  ;;  %v68_v37 = vadd.f32 5.9604645e-08, %v66_v35 }
  0x39   :  { %v303_v38 = vadd.f32 -1.0, %v69_v36  ;;  %v70_v39 = vmul.f32 2.0, %v68_v37 }
  0x3b   :  { %v73_v40 = vsub.f32 1.0, %v303_v38  ;;  %v75_v41 = vadd.f32 1.0, %v303_v38  ;;  %v307_v42 = vadd.f32 -1.0, %v70_v39 }
  0x3d   :  { %v77_v43 = vmul.f32 %v75_v41, %v73_v40  ;;  %v74_v44 = vsub.f32 1.0, %v307_v42  ;;  %v76_v45 = vadd.f32 1.0, %v307_v42 }
  0x3f   :  { %210 = vlog2.f32 %v77_v43  ;;  %v78_v46 = vmul.f32 %v76_v45, %v74_v44 }
  0x41   :  { %212 = vlog2.f32 %v78_v46 }
  0x49   :  { %v211_v47 = vpop.eup %210 }
  0x4a   :  { %v80_v48 = vmul.f32 0.6931472, %v211_v47 }
  0x4b   :  { %v213_v49 = vpop.eup %212 }
  0x4c   :  { %v311_v50 = vsub.f32 0.0, %v80_v48  ;;  %v82_v51 = vmul.f32 0.6931472, %v213_v49 }
  0x4e   :  { %v314_v52 = vadd.f32 -2.5, %v311_v50  ;;  %214 = vrsqrt.f32 %v311_v50  ;;  %v317_v53 = vsub.f32 0.0, %v82_v51  ;;  %vm89_vm0 = vcmp.eq.f32.partialorder %v311_v50, inf }
  0x4f   :  { %v92_v63 = vand.u32 2147483648, %v311_v50  ;;  %vm91_vm1 = vcmp.eq.f32.partialorder %v311_v50, 0.0  ;;  %vm167_vm4 = vcmp.lt.f32.partialorder %v311_v50, 5.0 }
  0x50   :  { %v103_v54 = vmul.f32 2.8102264e-08, %v314_v52  ;;  %v321_v55 = vadd.f32 -2.5, %v317_v53  ;;  %216 = vrsqrt.f32 %v317_v53  ;;  %vm96_vm2 = vcmp.eq.f32.partialorder %v317_v53, inf }
  0x51   :  { %v99_v6 = vand.u32 2147483648, %v317_v53  ;;  %vm98_vm3 = vcmp.eq.f32.partialorder %v317_v53, 0.0  ;;  %vm168_vm5 = vcmp.lt.f32.partialorder %v317_v53, 5.0 }
  0x52   :  { %v105_v56 = vadd.f32 3.4327394e-07, %v103_v54  ;;  %v104_v57 = vmul.f32 2.8102264e-08, %v321_v55 }
  0x54   :  { %v107_v58 = vmul.f32 %v314_v52, %v105_v56  ;;  %v106_v59 = vadd.f32 3.4327394e-07, %v104_v57 }
  0x56   :  { %v109_v60 = vadd.f32 -3.5233877e-06, %v107_v58  ;;  %v108_v61 = vmul.f32 %v321_v55, %v106_v59 }
  0x58   :  { %v215_v62 = vpop.eup %214  ;;  %v111_v0 = vmul.f32 %v314_v52, %v109_v60  ;;  %v110_v2 = vadd.f32 -3.5233877e-06, %v108_v61 }
  0x59   :  { %v88_v1 = vmul.f32 %v215_v62, %v311_v50 }
  0x5a   :  { %v113_v3 = vadd.f32 -4.3915065e-06, %v111_v0  ;;  %v217_v4 = vpop.eup %216  ;;  %v112_v7 = vmul.f32 %v321_v55, %v110_v2 }
  0x5b   :  { %v90_v5 = vsel %vm89_vm0, %v311_v50, %v88_v1  ;;  %v95_v10 = vmul.f32 %v217_v4, %v317_v53 }
  0x5c   :  { %v93_v8 = vsel %vm91_vm1, %v92_v63, %v90_v5  ;;  %v115_v9 = vmul.f32 %v314_v52, %v113_v3  ;;  %v114_v12 = vadd.f32 -4.3915065e-06, %v112_v7 }
  0x5d   :  { %v204_v11 = vadd.f32 -3.0, %v93_v8  ;;  %v97_v14 = vsel %vm96_vm2, %v317_v53, %v95_v10 }
  0x5e   :  { %v117_v13 = vadd.f32 0.00021858087, %v115_v9  ;;  %v100_v16 = vsel %vm98_vm3, %v99_v6, %v97_v14  ;;  %v116_v17 = vmul.f32 %v321_v55, %v114_v12 }
  0x5f   :  { %v135_v15 = vmul.f32 -0.00020021426, %v204_v11  ;;  %v205_v19 = vadd.f32 -3.0, %v100_v16  ;;  %v178_v16 = vld [vmem:[#allocation4 + $0x8] sm:$0xff] }
  0x60   :  { %v119_v18 = vmul.f32 %v314_v52, %v117_v13  ;;  %v118_v21 = vadd.f32 0.00021858087, %v116_v17  ;;  %v177_v13 = vld [vmem:[#allocation4] sm:$0xff] }
  0x61   :  { %v137_v20 = vadd.f32 0.00010095056, %v135_v15  ;;  %v136_v22 = vmul.f32 -0.00020021426, %v205_v19 }
  0x62   :  { %v121_v23 = vadd.f32 -0.001253725, %v119_v18  ;;  %v120_v25 = vmul.f32 %v321_v55, %v118_v21 }
  0x63   :  { %v139_v24 = vmul.f32 %v204_v11, %v137_v20  ;;  %v138_v26 = vadd.f32 0.00010095056, %v136_v22 }
  0x64   :  { %v122_v28 = vadd.f32 -0.001253725, %v120_v25  ;;  %v123_v30 = vmul.f32 %v314_v52, %v121_v23 }
  0x65   :  { %v141_v27 = vadd.f32 0.0013493432, %v139_v24  ;;  %v140_v29 = vmul.f32 %v205_v19, %v138_v26 }
  0x66   :  { %v124_v34 = vmul.f32 %v321_v55, %v122_v28  ;;  %v125_v36 = vadd.f32 -0.0041776816, %v123_v30 }
  0x67   :  { %v143_v31 = vmul.f32 %v204_v11, %v141_v27  ;;  %v142_v32 = vadd.f32 0.0013493432, %v140_v29 }
  0x68   :  { %v126_v41 = vadd.f32 -0.0041776816, %v124_v34  ;;  %v127_v44 = vmul.f32 %v314_v52, %v125_v36 }
  0x69   :  { %v145_v33 = vadd.f32 -0.0036734284, %v143_v31  ;;  %v144_v35 = vmul.f32 %v205_v19, %v142_v32 }
  0x6a   :  { %v128_v48 = vmul.f32 %v321_v55, %v126_v41  ;;  %v129_v51 = vadd.f32 0.24664073, %v127_v44 }
  0x6b   :  { %v147_v37 = vmul.f32 %v204_v11, %v145_v33  ;;  %v146_v39 = vadd.f32 -0.0036734284, %v144_v35 }
  0x6c   :  { %v130_v58 = vadd.f32 0.24664073, %v128_v48  ;;  %v131_v60 = vmul.f32 %v314_v52, %v129_v51 }
  0x6d   :  { %v149_v40 = vadd.f32 0.0057395077, %v147_v37  ;;  %v148_v43 = vmul.f32 %v205_v19, %v146_v39 }
  0x6e   :  { %v132_v0 = vmul.f32 %v321_v55, %v130_v58  ;;  %v133_v2 = vadd.f32 1.5014094, %v131_v60 }
  0x6f   :  { %v151_v45 = vmul.f32 %v204_v11, %v149_v40  ;;  %v150_v46 = vadd.f32 0.0057395077, %v148_v43 }
  0x70   :  { %v134_v6 = vadd.f32 1.5014094, %v132_v0 }
  0x71   :  { %v153_v47 = vadd.f32 -0.0076224613, %v151_v45  ;;  %v152_v49 = vmul.f32 %v205_v19, %v150_v46 }
  0x73   :  { %v155_v54 = vmul.f32 %v204_v11, %v153_v47  ;;  %v154_v56 = vadd.f32 -0.0076224613, %v152_v49 }
  0x75   :  { %v157_v57 = vadd.f32 0.0094388705, %v155_v54  ;;  %v156_v59 = vmul.f32 %v205_v19, %v154_v56 }
  0x77   :  { %v159_v61 = vmul.f32 %v204_v11, %v157_v57  ;;  %v158_v62 = vadd.f32 0.0094388705, %v156_v59 }
  0x79   :  { %v161_v63 = vadd.f32 1.001674, %v159_v61  ;;  %v160_v1 = vmul.f32 %v205_v19, %v158_v62 }
  0x7b   :  { %v163_v3 = vmul.f32 %v204_v11, %v161_v63  ;;  %v162_v4 = vadd.f32 1.001674, %v160_v1 }
  0x7d   :  { %v165_v5 = vadd.f32 2.8329768, %v163_v3  ;;  %v164_v7 = vmul.f32 %v205_v19, %v162_v4 }
  0x7f   :  { %v169_v8 = vsel %vm167_vm4, %v133_v2, %v165_v5  ;;  %v166_v52 = vadd.f32 2.8329768, %v164_v7 }
  0x80   :  { %v171_v9 = vmul.f32 %v303_v38, %v169_v8 }
  0x81   :  { %v170_v12 = vsel %vm168_vm5, %v134_v6, %v166_v52 }
  0x82   :  { %v173_v10 = vmul.f32 1.4142135, %v171_v9  ;;  %v172_v55 = vmul.f32 %v307_v42, %v170_v12 }
  0x84   :  { %v175_v14 = vmul.f32 0.1, %v173_v10  ;;  %v174_v15 = vmul.f32 1.4142135, %v172_v55 }
  0x86   :  { %v179_v11 = vadd.f32 %v177_v13, %v175_v14  ;;  %v176_v50 = vmul.f32 0.1, %v174_v15 }
  0x88   :  { %181 = vst [vmem:[#allocation7] sm:$0xff] %v179_v11  ;;  %v180_v17 = vadd.f32 %v178_v16, %v176_v50 }
  0x8a   :  { %182 = vst [vmem:[#allocation7 + $0x8] sm:$0xff] %v180_v17 }
  0x8b   :  { %251 = shalt.err (!%p248_p12)
}
  0x8c   :  { %s252_s29 = scalar_lea.hbm %s370_s2, 256 }
  0x8d   :  { %p253_p13 = scmp.ne.s32.totalorder %s370_s2, %s252_s29  ;;  %p256_p0 = scmp.lt.u32.totalorder %s252_s29, %s370_s2 }
  0x8f   :  { %p258_p1 = pnand %p256_p0, %p253_p13 }
  0x91   :  { %261 = shalt.err (!%p258_p1)
}
  0x92   :  { %194 = dma.vmem_to_hbm [thread:$0]  %s189_s1, 256, %s370_s2, [#allocation6], %s267_s19, %s267_s19, %s268_s20  }
  0x93   :  { %264 = dma.done.wait [#allocation6], 256  }
  0x94   :  { %265 = vsyncadd [#allocation6], 4294967040 }
  0x95   :  { %198 = vsyncpa [#allocation5], 1 }
  0x96   :  { %199 = vsyncpa [#allocation6], 1 }

</bundles_post_ra>
